<compile_context>
chip_gen: v7x
topology: tpu7x:2x2x1
jax: 0.10.0
libtpu: 0.0.40
codegen_flags: <defaults>
</compile_context>

<pallas_src>
import functools

import jax
import jax.numpy as jnp
from jax.experimental import pallas as pl
from jax.experimental.pallas import tpu as pltpu

EPS = 1e-5


# ---------------------------------------------------------------------------
# Kernel 1: conv3x3 (+bias) with in-kernel tap formation, fused with per-batch
# partial channel sum / sum-of-squares for BatchNorm.  grid = (N,), parallel.
#
#   x_ref : (Cin, L)  bf16, L = Hp*Wp + 2*(Wp+1)   (padded + flat margin)
#   w_ref : (9, Cout, Cin) bf16                    (tap-major weights)
#   b_ref : (Cout, 1) f32
#   m_ref : (1, Hp*Wp) f32                         (1 on valid pixels, 0 on halo)
#   y_ref : (Cout, Hp*Wp) bf16                     (padded-grid conv output)
#   st_ref: (Cout, 2) f32                          ([:,0]=sum, [:,1]=sum of sq)
# ---------------------------------------------------------------------------
def _conv_stats_kernel(x_ref, w_ref, b_ref, m_ref, y_ref, st_ref, *, wp, hpwp):
    x = x_ref[...]                                    # (Cin, L) bf16
    acc = None
    # 9 taps, statically unrolled: contiguous lane slices of the margin-padded
    # flat activation block, each one bf16 MXU dot accumulated in f32.
    for t in range(9):
        dy, dx = divmod(t, 3)
        off = dy * wp + dx                            # static lane offset
        xt = x[:, off:off + hpwp]                     # (Cin, Hp*Wp) bf16
        d = jnp.dot(w_ref[t], xt, preferred_element_type=jnp.float32)
        acc = d if acc is None else acc + d
    y = acc + b_ref[...]                              # (Cout, Hp*Wp) f32
    y_ref[...] = y.astype(y_ref.dtype)                # bf16 round-trip

    # Partial BN stats over VALID pixels only (halo masked out), f32.
    ym = y * m_ref[...]
    ssum = jnp.sum(ym, axis=1, keepdims=True)         # (Cout, 1)
    ssq = jnp.sum(ym * y, axis=1, keepdims=True)      # (Cout, 1)
    st_ref[...] = jnp.concatenate([ssum, ssq], axis=-1)


def conv3x3_stats_pallas(x_ext, w_taps, bias, mask, *, wp, hpwp):
    n, cin, l = x_ext.shape
    cout = w_taps.shape[1]
    kernel = functools.partial(_conv_stats_kernel, wp=wp, hpwp=hpwp)
    return pl.pallas_call(
        kernel,
        out_shape=(jax.ShapeDtypeStruct((n, cout, hpwp), jnp.bfloat16),
                   jax.ShapeDtypeStruct((n, cout, 2), jnp.float32)),
        grid=(n,),
        in_specs=[
            pl.BlockSpec((pl.Squeezed(), cin, l), lambda i: (i, 0, 0)),
            pl.BlockSpec((9, cout, cin), lambda i: (0, 0, 0)),
            pl.BlockSpec((cout, 1), lambda i: (0, 0)),
            pl.BlockSpec((1, hpwp), lambda i: (0, 0)),
        ],
        out_specs=(
            pl.BlockSpec((pl.Squeezed(), cout, hpwp), lambda i: (i, 0, 0)),
            pl.BlockSpec((pl.Squeezed(), cout, 2), lambda i: (i, 0, 0)),
        ),
        compiler_params=pltpu.CompilerParams(
            dimension_semantics=("parallel",),
            vmem_limit_bytes=32 * 1024 * 1024),
    )(x_ext, w_taps, bias, mask)


# ---------------------------------------------------------------------------
# Kernel 2: y * scale + shift -> ReLU.  Pure lane-dense FMA over (Cout, P)
# tiles (P multiple of 128), scale/shift precomputed once.  grid = (N,).
# ---------------------------------------------------------------------------
def _bn_relu_kernel(y_ref, scale_ref, shift_ref, o_ref):
    y = y_ref[...].astype(jnp.float32)                # (Cout, P)
    o_ref[...] = jnp.maximum(y * scale_ref[...] + shift_ref[...], 0.0)


def bn_relu_pallas(y, scale, shift):
    n, cout, p = y.shape
    tile = pl.BlockSpec((pl.Squeezed(), cout, p), lambda i: (i, 0, 0))
    chan = pl.BlockSpec((cout, 1), lambda i: (0, 0))
    return pl.pallas_call(
        _bn_relu_kernel,
        out_shape=jax.ShapeDtypeStruct((n, cout, p), jnp.float32),
        grid=(n,),
        in_specs=[tile, chan, chan],
        out_specs=tile,
        compiler_params=pltpu.CompilerParams(
            dimension_semantics=("parallel",),
            vmem_limit_bytes=32 * 1024 * 1024),
    )(y, scale, shift)


# ---------------------------------------------------------------------------
# Wrapper: NCHW in -> NCHW out.
# ---------------------------------------------------------------------------
@jax.jit
def single_conv_pallas(x, w, b, gamma, beta):
    n, cin, h, wd = x.shape
    cout = w.shape[0]
    hp, wp = h + 2, wd + 2
    hpwp = hp * wp
    margin = wp + 1                 # >= max |tap offset| on the flat axis

    # Conv halo pad + flatten spatial + flat margin pad, cast to bf16.
    # Each of the 9 taps is then a contiguous static slice inside the kernel.
    xp = jnp.pad(x, ((0, 0), (0, 0), (1, 1), (1, 1)))
    x_ext = jnp.pad(xp.reshape(n, cin, hpwp),
                    ((0, 0), (0, 0), (margin, margin))).astype(jnp.bfloat16)

    # w[o, c, dy, dx] -> w_taps[dy*3+dx, o, c], bf16 MXU operands.
    w_taps = (jnp.transpose(w, (2, 3, 0, 1))
              .reshape(9, cout, cin).astype(jnp.bfloat16))

    # Validity mask over the padded output grid (halo positions excluded from
    # BN statistics; they are discarded below).
    rows = (jnp.arange(hp) >= 1) & (jnp.arange(hp) <= h)
    cols = (jnp.arange(wp) >= 1) & (jnp.arange(wp) <= wd)
    mask = (rows[:, None] & cols[None, :]).astype(jnp.float32).reshape(1, hpwp)

    y_pad, stats = conv3x3_stats_pallas(
        x_ext, w_taps, b.reshape(cout, 1).astype(jnp.float32), mask,
        wp=wp, hpwp=hpwp)

    # Finalize BN statistics once (tiny per-channel reduction, plain JAX) and
    # fold gamma/beta into a single scale/shift pair.
    count = float(n * h * wd)
    ssum = jnp.sum(stats[:, :, 0], axis=0)                  # (Cout,)
    ssq = jnp.sum(stats[:, :, 1], axis=0)                   # (Cout,)
    mean = ssum / count
    var = jnp.maximum(ssq / count - mean * mean, 0.0)       # biased, clamped
    g_inv = gamma * jax.lax.rsqrt(var + EPS)
    scale = g_inv.reshape(cout, 1)
    shift = (beta - mean * g_inv).reshape(cout, 1)

    # Drop the conv halo, back to a lane-dense (N, Cout, H*W) slab.
    y = y_pad.reshape(n, cout, hp, wp)[:, :, 1:1 + h, 1:1 + wd]
    y = y.reshape(n, cout, h * wd)

    out = bn_relu_pallas(y, scale, shift)
    return out.reshape(n, cout, h, wd)                      # NCHW


# ---------------------------------------------------------------------------
# Pure-JAX reference (mirrors PyTorch SingleConv.forward in training mode).
# ---------------------------------------------------------------------------
def single_conv_reference(x, w, b, gamma, beta):
    y = jax.lax.conv_general_dilated(
        x, w, (1, 1), "SAME",
        dimension_numbers=("NCHW", "OIHW", "NCHW"),
        precision=jax.lax.Precision.HIGHEST) + b[None, :, None, None]
    mean = jnp.mean(y, axis=(0, 2, 3), keepdims=True)
    var = jnp.var(y, axis=(0, 2, 3), keepdims=True)          # biased
    yn = (y - mean) * jax.lax.rsqrt(var + EPS)
    yn = yn * gamma[None, :, None, None] + beta[None, :, None, None]
    return jnp.maximum(yn, 0.0)


if __name__ == "__main__":
    N, C_IN, C_OUT, H, W = 2, 4, 8, 16, 16
    key = jax.random.PRNGKey(0)
    kx, kw, kb, kg, kbe = jax.random.split(key, 5)

    x = jax.random.normal(kx, (N, C_IN, H, W), jnp.float32)
    w = 0.2 * jax.random.normal(kw, (C_OUT, C_IN, 3, 3), jnp.float32)
    b = 0.1 * jax.random.normal(kb, (C_OUT,), jnp.float32)
    gamma = 1.0 + 0.1 * jax.random.normal(kg, (C_OUT,), jnp.float32)
    beta = 0.1 * jax.random.normal(kbe, (C_OUT,), jnp.float32)

    out = jax.block_until_ready(single_conv_pallas(x, w, b, gamma, beta))
    ref = jax.block_until_ready(single_conv_reference(x, w, b, gamma, beta))

    assert out.shape == (N, C_OUT, H, W), out.shape
    err = float(jnp.max(jnp.abs(out - ref)))
    # bf16 MXU operands / bf16 y round-trip vs HIGHEST-precision f32 reference.
    assert err < 5e-2, err
    print("KERNEL_OK")
</pallas_src>

<mosaic_0001>
module attributes {stable_mosaic.version = 11 : i64} {
  func.func @_conv_stats_kernel(%arg0: i32, %arg1: memref<1x4x362xbf16, #tpu.memory_space<vmem>>, %arg2: memref<9x8x4xbf16, #tpu.memory_space<vmem>>, %arg3: memref<8x1xf32, #tpu.memory_space<vmem>>, %arg4: memref<1x324xf32, #tpu.memory_space<vmem>>, %arg5: memref<1x8x324xbf16, #tpu.memory_space<vmem>>, %arg6: memref<1x8x2xf32, #tpu.memory_space<vmem>>) attributes {dimension_semantics = [#tpu.dimension_semantics<parallel>], iteration_bounds = array<i64: 2>, scalar_prefetch = 0 : i64, scratch_operands = 0 : i64, tpu.core_type = #tpu.core_type<tc>, window_params = [{transform_indices = @transform_0, window_bounds = array<i64: 1, 4, 362>}, {pipeline_mode = #tpu.pipeline_mode<synchronous>, transform_indices = @transform_1, window_bounds = array<i64: 9, 8, 4>}, {pipeline_mode = #tpu.pipeline_mode<synchronous>, transform_indices = @transform_2, window_bounds = array<i64: 8, 1>}, {pipeline_mode = #tpu.pipeline_mode<synchronous>, transform_indices = @transform_3, window_bounds = array<i64: 1, 324>}, {transform_indices = @transform_4, window_bounds = array<i64: 1, 8, 324>}, {transform_indices = @transform_5, window_bounds = array<i64: 1, 8, 2>}]} {
    %c0 = arith.constant 0 : index
    %c0_0 = arith.constant 0 : index
    %c0_1 = arith.constant 0 : index
    %0 = vector.load %arg1[%c0, %c0_0, %c0_1] : memref<1x4x362xbf16, #tpu.memory_space<vmem>>, vector<1x4x362xbf16>
    %1 = vector.shape_cast %0 : vector<1x4x362xbf16> to vector<4x362xbf16>
    %2 = vector.extract_strided_slice %1 {offsets = [0, 0], sizes = [4, 324], strides = [1, 1]} : vector<4x362xbf16> to vector<4x324xbf16>
    %c0_2 = arith.constant 0 : index
    %c0_3 = arith.constant 0 : index
    %c0_4 = arith.constant 0 : index
    %3 = vector.load %arg2[%c0_2, %c0_3, %c0_4] : memref<9x8x4xbf16, #tpu.memory_space<vmem>>, vector<1x8x4xbf16>
    %4 = vector.shape_cast %3 : vector<1x8x4xbf16> to vector<8x4xbf16>
    %cst = arith.constant dense<0.000000e+00> : vector<8x324xf32>
    %5 = tpu.matmul %4, %2, %cst {dimension_numbers = #tpu.dot_dimension_numbers<[1], [0], [0], [1], [0, 0, 1, 1], [], []>} : vector<8x4xbf16>, vector<4x324xbf16>, vector<8x324xf32> -> vector<8x324xf32>
    %6 = vector.extract_strided_slice %1 {offsets = [0, 1], sizes = [4, 324], strides = [1, 1]} : vector<4x362xbf16> to vector<4x324xbf16>
    %c1 = arith.constant 1 : index
    %c0_5 = arith.constant 0 : index
    %c0_6 = arith.constant 0 : index
    %7 = vector.load %arg2[%c1, %c0_5, %c0_6] : memref<9x8x4xbf16, #tpu.memory_space<vmem>>, vector<1x8x4xbf16>
    %8 = vector.shape_cast %7 : vector<1x8x4xbf16> to vector<8x4xbf16>
    %cst_7 = arith.constant dense<0.000000e+00> : vector<8x324xf32>
    %9 = tpu.matmul %8, %6, %cst_7 {dimension_numbers = #tpu.dot_dimension_numbers<[1], [0], [0], [1], [0, 0, 1, 1], [], []>} : vector<8x4xbf16>, vector<4x324xbf16>, vector<8x324xf32> -> vector<8x324xf32>
    %10 = arith.addf %5, %9 : vector<8x324xf32>
    %11 = vector.extract_strided_slice %1 {offsets = [0, 2], sizes = [4, 324], strides = [1, 1]} : vector<4x362xbf16> to vector<4x324xbf16>
    %c2 = arith.constant 2 : index
    %c0_8 = arith.constant 0 : index
    %c0_9 = arith.constant 0 : index
    %12 = vector.load %arg2[%c2, %c0_8, %c0_9] : memref<9x8x4xbf16, #tpu.memory_space<vmem>>, vector<1x8x4xbf16>
    %13 = vector.shape_cast %12 : vector<1x8x4xbf16> to vector<8x4xbf16>
    %cst_10 = arith.constant dense<0.000000e+00> : vector<8x324xf32>
    %14 = tpu.matmul %13, %11, %cst_10 {dimension_numbers = #tpu.dot_dimension_numbers<[1], [0], [0], [1], [0, 0, 1, 1], [], []>} : vector<8x4xbf16>, vector<4x324xbf16>, vector<8x324xf32> -> vector<8x324xf32>
    %15 = arith.addf %10, %14 : vector<8x324xf32>
    %16 = vector.extract_strided_slice %1 {offsets = [0, 18], sizes = [4, 324], strides = [1, 1]} : vector<4x362xbf16> to vector<4x324xbf16>
    %c3 = arith.constant 3 : index
    %c0_11 = arith.constant 0 : index
    %c0_12 = arith.constant 0 : index
    %17 = vector.load %arg2[%c3, %c0_11, %c0_12] : memref<9x8x4xbf16, #tpu.memory_space<vmem>>, vector<1x8x4xbf16>
    %18 = vector.shape_cast %17 : vector<1x8x4xbf16> to vector<8x4xbf16>
    %cst_13 = arith.constant dense<0.000000e+00> : vector<8x324xf32>
    %19 = tpu.matmul %18, %16, %cst_13 {dimension_numbers = #tpu.dot_dimension_numbers<[1], [0], [0], [1], [0, 0, 1, 1], [], []>} : vector<8x4xbf16>, vector<4x324xbf16>, vector<8x324xf32> -> vector<8x324xf32>
    %20 = arith.addf %15, %19 : vector<8x324xf32>
    %21 = vector.extract_strided_slice %1 {offsets = [0, 19], sizes = [4, 324], strides = [1, 1]} : vector<4x362xbf16> to vector<4x324xbf16>
    %c4 = arith.constant 4 : index
    %c0_14 = arith.constant 0 : index
    %c0_15 = arith.constant 0 : index
    %22 = vector.load %arg2[%c4, %c0_14, %c0_15] : memref<9x8x4xbf16, #tpu.memory_space<vmem>>, vector<1x8x4xbf16>
    %23 = vector.shape_cast %22 : vector<1x8x4xbf16> to vector<8x4xbf16>
    %cst_16 = arith.constant dense<0.000000e+00> : vector<8x324xf32>
    %24 = tpu.matmul %23, %21, %cst_16 {dimension_numbers = #tpu.dot_dimension_numbers<[1], [0], [0], [1], [0, 0, 1, 1], [], []>} : vector<8x4xbf16>, vector<4x324xbf16>, vector<8x324xf32> -> vector<8x324xf32>
    %25 = arith.addf %20, %24 : vector<8x324xf32>
    %26 = vector.extract_strided_slice %1 {offsets = [0, 20], sizes = [4, 324], strides = [1, 1]} : vector<4x362xbf16> to vector<4x324xbf16>
    %c5 = arith.constant 5 : index
    %c0_17 = arith.constant 0 : index
    %c0_18 = arith.constant 0 : index
    %27 = vector.load %arg2[%c5, %c0_17, %c0_18] : memref<9x8x4xbf16, #tpu.memory_space<vmem>>, vector<1x8x4xbf16>
    %28 = vector.shape_cast %27 : vector<1x8x4xbf16> to vector<8x4xbf16>
    %cst_19 = arith.constant dense<0.000000e+00> : vector<8x324xf32>
    %29 = tpu.matmul %28, %26, %cst_19 {dimension_numbers = #tpu.dot_dimension_numbers<[1], [0], [0], [1], [0, 0, 1, 1], [], []>} : vector<8x4xbf16>, vector<4x324xbf16>, vector<8x324xf32> -> vector<8x324xf32>
    %30 = arith.addf %25, %29 : vector<8x324xf32>
    %31 = vector.extract_strided_slice %1 {offsets = [0, 36], sizes = [4, 324], strides = [1, 1]} : vector<4x362xbf16> to vector<4x324xbf16>
    %c6 = arith.constant 6 : index
    %c0_20 = arith.constant 0 : index
    %c0_21 = arith.constant 0 : index
    %32 = vector.load %arg2[%c6, %c0_20, %c0_21] : memref<9x8x4xbf16, #tpu.memory_space<vmem>>, vector<1x8x4xbf16>
    %33 = vector.shape_cast %32 : vector<1x8x4xbf16> to vector<8x4xbf16>
    %cst_22 = arith.constant dense<0.000000e+00> : vector<8x324xf32>
    %34 = tpu.matmul %33, %31, %cst_22 {dimension_numbers = #tpu.dot_dimension_numbers<[1], [0], [0], [1], [0, 0, 1, 1], [], []>} : vector<8x4xbf16>, vector<4x324xbf16>, vector<8x324xf32> -> vector<8x324xf32>
    %35 = arith.addf %30, %34 : vector<8x324xf32>
    %36 = vector.extract_strided_slice %1 {offsets = [0, 37], sizes = [4, 324], strides = [1, 1]} : vector<4x362xbf16> to vector<4x324xbf16>
    %c7 = arith.constant 7 : index
    %c0_23 = arith.constant 0 : index
    %c0_24 = arith.constant 0 : index
    %37 = vector.load %arg2[%c7, %c0_23, %c0_24] : memref<9x8x4xbf16, #tpu.memory_space<vmem>>, vector<1x8x4xbf16>
    %38 = vector.shape_cast %37 : vector<1x8x4xbf16> to vector<8x4xbf16>
    %cst_25 = arith.constant dense<0.000000e+00> : vector<8x324xf32>
    %39 = tpu.matmul %38, %36, %cst_25 {dimension_numbers = #tpu.dot_dimension_numbers<[1], [0], [0], [1], [0, 0, 1, 1], [], []>} : vector<8x4xbf16>, vector<4x324xbf16>, vector<8x324xf32> -> vector<8x324xf32>
    %40 = arith.addf %35, %39 : vector<8x324xf32>
    %41 = vector.extract_strided_slice %1 {offsets = [0, 38], sizes = [4, 324], strides = [1, 1]} : vector<4x362xbf16> to vector<4x324xbf16>
    %c8 = arith.constant 8 : index
    %c0_26 = arith.constant 0 : index
    %c0_27 = arith.constant 0 : index
    %42 = vector.load %arg2[%c8, %c0_26, %c0_27] : memref<9x8x4xbf16, #tpu.memory_space<vmem>>, vector<1x8x4xbf16>
    %43 = vector.shape_cast %42 : vector<1x8x4xbf16> to vector<8x4xbf16>
    %cst_28 = arith.constant dense<0.000000e+00> : vector<8x324xf32>
    %44 = tpu.matmul %43, %41, %cst_28 {dimension_numbers = #tpu.dot_dimension_numbers<[1], [0], [0], [1], [0, 0, 1, 1], [], []>} : vector<8x4xbf16>, vector<4x324xbf16>, vector<8x324xf32> -> vector<8x324xf32>
    %45 = arith.addf %40, %44 : vector<8x324xf32>
    %c0_29 = arith.constant 0 : index
    %c0_30 = arith.constant 0 : index
    %46 = vector.load %arg3[%c0_29, %c0_30] : memref<8x1xf32, #tpu.memory_space<vmem>>, vector<8x1xf32>
    %47 = vector.broadcast %46 : vector<8x1xf32> to vector<8x324xf32>
    %48 = arith.addf %45, %47 : vector<8x324xf32>
    %49 = arith.truncf %48 : vector<8x324xf32> to vector<8x324xbf16>
    %c0_31 = arith.constant 0 : index
    %c0_32 = arith.constant 0 : index
    %c0_33 = arith.constant 0 : index
    %50 = vector.load %arg5[%c0_31, %c0_32, %c0_33] : memref<1x8x324xbf16, #tpu.memory_space<vmem>>, vector<1x8x324xbf16>
    %51 = vector.shape_cast %50 : vector<1x8x324xbf16> to vector<8x324xbf16>
    %52 = vector.shape_cast %49 : vector<8x324xbf16> to vector<1x8x324xbf16>
    tpu.vector_store %arg5[%c0_31, %c0_32, %c0_33], %52 {strides = array<i32>} : memref<1x8x324xbf16, #tpu.memory_space<vmem>>, vector<1x8x324xbf16>,
    %c0_34 = arith.constant 0 : index
    %c0_35 = arith.constant 0 : index
    %53 = vector.load %arg4[%c0_34, %c0_35] : memref<1x324xf32, #tpu.memory_space<vmem>>, vector<1x324xf32>
    %54 = vector.broadcast %53 : vector<1x324xf32> to vector<8x324xf32>
    %55 = arith.mulf %48, %54 : vector<8x324xf32>
    %cst_36 = arith.constant dense<0.000000e+00> : vector<8xf32>
    %56 = vector.multi_reduction <add>, %55, %cst_36 [1] : vector<8x324xf32> to vector<8xf32>
    %57 = vector.shape_cast %56 : vector<8xf32> to vector<8x1xf32>
    %58 = arith.mulf %55, %48 : vector<8x324xf32>
    %cst_37 = arith.constant dense<0.000000e+00> : vector<8xf32>
    %59 = vector.multi_reduction <add>, %58, %cst_37 [1] : vector<8x324xf32> to vector<8xf32>
    %60 = vector.shape_cast %59 : vector<8xf32> to vector<8x1xf32>
    %61 = tpu.concatenate %57, %60 in 1 : vector<8x1xf32>, vector<8x1xf32> -> vector<8x2xf32>
    %c0_38 = arith.constant 0 : index
    %c0_39 = arith.constant 0 : index
    %c0_40 = arith.constant 0 : index
    %62 = vector.load %arg6[%c0_38, %c0_39, %c0_40] : memref<1x8x2xf32, #tpu.memory_space<vmem>>, vector<1x8x2xf32>
    %63 = vector.shape_cast %62 : vector<1x8x2xf32> to vector<8x2xf32>
    %64 = vector.shape_cast %61 : vector<8x2xf32> to vector<1x8x2xf32>
    tpu.vector_store %arg6[%c0_38, %c0_39, %c0_40], %64 {strides = array<i32>} : memref<1x8x2xf32, #tpu.memory_space<vmem>>, vector<1x8x2xf32>,
    return
  }
  func.func @transform_0(%arg0: i32) -> (i32, i32, i32) {
    %c0_i32 = arith.constant 0 : i32
    %c0_i32_0 = arith.constant 0 : i32
    %c0_i32_1 = arith.constant 0 : i32
    return %arg0, %c0_i32, %c0_i32_0 : i32, i32, i32
  }
  func.func @transform_1(%arg0: i32) -> (i32, i32, i32) {
    %c0_i32 = arith.constant 0 : i32
    %c0_i32_0 = arith.constant 0 : i32
    %c0_i32_1 = arith.constant 0 : i32
    %c0_i32_2 = arith.constant 0 : i32
    return %c0_i32, %c0_i32_0, %c0_i32_1 : i32, i32, i32
  }
  func.func @transform_2(%arg0: i32) -> (i32, i32) {
    %c0_i32 = arith.constant 0 : i32
    %c0_i32_0 = arith.constant 0 : i32
    %c0_i32_1 = arith.constant 0 : i32
    return %c0_i32, %c0_i32_0 : i32, i32
  }
  func.func @transform_3(%arg0: i32) -> (i32, i32) {
    %c0_i32 = arith.constant 0 : i32
    %c0_i32_0 = arith.constant 0 : i32
    %c0_i32_1 = arith.constant 0 : i32
    return %c0_i32, %c0_i32_0 : i32, i32
  }
  func.func @transform_4(%arg0: i32) -> (i32, i32, i32) {
    %c0_i32 = arith.constant 0 : i32
    %c0_i32_0 = arith.constant 0 : i32
    %c0_i32_1 = arith.constant 0 : i32
    return %arg0, %c0_i32, %c0_i32_0 : i32, i32, i32
  }
  func.func @transform_5(%arg0: i32) -> (i32, i32, i32) {
    %c0_i32 = arith.constant 0 : i32
    %c0_i32_0 = arith.constant 0 : i32
    %c0_i32_1 = arith.constant 0 : i32
    return %arg0, %c0_i32, %c0_i32_0 : i32, i32, i32
  }
}

module attributes {stable_mosaic.version = 11 : i64} {
  func.func @_bn_relu_kernel(%arg0: i32, %arg1: memref<1x8x256xbf16, #tpu.memory_space<vmem>>, %arg2: memref<8x1xf32, #tpu.memory_space<vmem>>, %arg3: memref<8x1xf32, #tpu.memory_space<vmem>>, %arg4: memref<1x8x256xf32, #tpu.memory_space<vmem>>) attributes {dimension_semantics = [#tpu.dimension_semantics<parallel>], iteration_bounds = array<i64: 2>, scalar_prefetch = 0 : i64, scratch_operands = 0 : i64, tpu.core_type = #tpu.core_type<tc>, window_params = [{transform_indices = @transform_0, window_bounds = array<i64: 1, 8, 256>}, {pipeline_mode = #tpu.pipeline_mode<synchronous>, transform_indices = @transform_1, window_bounds = array<i64: 8, 1>}, {pipeline_mode = #tpu.pipeline_mode<synchronous>, transform_indices = @transform_2, window_bounds = array<i64: 8, 1>}, {transform_indices = @transform_3, window_bounds = array<i64: 1, 8, 256>}]} {
    %c0 = arith.constant 0 : index
    %c0_0 = arith.constant 0 : index
    %c0_1 = arith.constant 0 : index
    %0 = vector.load %arg1[%c0, %c0_0, %c0_1] : memref<1x8x256xbf16, #tpu.memory_space<vmem>>, vector<1x8x256xbf16>
    %1 = vector.shape_cast %0 : vector<1x8x256xbf16> to vector<8x256xbf16>
    %2 = arith.extf %1 : vector<8x256xbf16> to vector<8x256xf32>
    %c0_2 = arith.constant 0 : index
    %c0_3 = arith.constant 0 : index
    %3 = vector.load %arg2[%c0_2, %c0_3] : memref<8x1xf32, #tpu.memory_space<vmem>>, vector<8x1xf32>
    %4 = vector.broadcast %3 : vector<8x1xf32> to vector<8x256xf32>
    %5 = arith.mulf %2, %4 : vector<8x256xf32>
    %c0_4 = arith.constant 0 : index
    %c0_5 = arith.constant 0 : index
    %6 = vector.load %arg3[%c0_4, %c0_5] : memref<8x1xf32, #tpu.memory_space<vmem>>, vector<8x1xf32>
    %7 = vector.broadcast %6 : vector<8x1xf32> to vector<8x256xf32>
    %8 = arith.addf %5, %7 : vector<8x256xf32>
    %cst = arith.constant 0.000000e+00 : f32
    %9 = vector.broadcast %cst : f32 to vector<8x256xf32>
    %10 = arith.maximumf %8, %9 : vector<8x256xf32>
    %c0_6 = arith.constant 0 : index
    %c0_7 = arith.constant 0 : index
    %c0_8 = arith.constant 0 : index
    %11 = vector.load %arg4[%c0_6, %c0_7, %c0_8] : memref<1x8x256xf32, #tpu.memory_space<vmem>>, vector<1x8x256xf32>
    %12 = vector.shape_cast %11 : vector<1x8x256xf32> to vector<8x256xf32>
    %13 = vector.shape_cast %10 : vector<8x256xf32> to vector<1x8x256xf32>
    tpu.vector_store %arg4[%c0_6, %c0_7, %c0_8], %13 {strides = array<i32>} : memref<1x8x256xf32, #tpu.memory_space<vmem>>, vector<1x8x256xf32>,
    return
  }
  func.func @transform_0(%arg0: i32) -> (i32, i32, i32) {
    %c0_i32 = arith.constant 0 : i32
    %c0_i32_0 = arith.constant 0 : i32
    %c0_i32_1 = arith.constant 0 : i32
    return %arg0, %c0_i32, %c0_i32_0 : i32, i32, i32
  }
  func.func @transform_1(%arg0: i32) -> (i32, i32) {
    %c0_i32 = arith.constant 0 : i32
    %c0_i32_0 = arith.constant 0 : i32
    %c0_i32_1 = arith.constant 0 : i32
    return %c0_i32, %c0_i32_0 : i32, i32
  }
  func.func @transform_2(%arg0: i32) -> (i32, i32) {
    %c0_i32 = arith.constant 0 : i32
    %c0_i32_0 = arith.constant 0 : i32
    %c0_i32_1 = arith.constant 0 : i32
    return %c0_i32, %c0_i32_0 : i32, i32
  }
  func.func @transform_3(%arg0: i32) -> (i32, i32, i32) {
    %c0_i32 = arith.constant 0 : i32
    %c0_i32_0 = arith.constant 0 : i32
    %c0_i32_1 = arith.constant 0 : i32
    return %arg0, %c0_i32, %c0_i32_0 : i32, i32, i32
  }
}

</mosaic_0001>

<bundles_post_ra>
// kernel: single_conv_pallas.3
= control target key start
LH: loop header
LB: loop body
LE: loop exit
PB: predicated region body
PF: predicated region fallthrough
CT: control target
= control target key end

     0   :  { %s301_s12 = smov 0   ;;  %s324_s0 = inlined_call_operand.vmem [shape: bf16[2,8,256], index: 0, kind: input, shape index: {}]   ;;  %s325_s1 = inlined_call_operand.vmem [shape: f32[8,1], index: 1, kind: input, shape index: {}]   ;;  %s326_s2 = inlined_call_operand.vmem [shape: f32[8,1], index: 2, kind: input, shape index: {}]   ;;  %s327_s3 = inlined_call_operand.vmem [shape: f32[2,8,256], index: 3, kind: output, shape index: {}]  }
   0x1 LB: > { %s249_s13 = sadd.s32 4294967295, %s278_s12   ;;  %p253_p0 = scmp.ge.s32.totalorder %s278_s12, 1  ;;  %s278_s12 = sphi %s301_s12, %s13_s12  }
   0x2   : > { %p137_p1 = scmp.lt.s32.totalorder %s278_s12, 3 }
   0x4   : > { %p138_p2 = pnand %p253_p0, %p137_p1 }
   0x5   : > { %v174_v0 = vld [vmem:[%s325_s1] sm:$0xff] (!%p138_p2)  ;;  %v280_v1 = vmov (!%p138_p2), 0   ;;  %p161_p3 = scmp.lt.s32.totalorder (!%p138_p2), %s249_s13, 1 }
   0x6   : > { %141 = sbr.rel (%p138_p2) target bundleno = 144 (0x90), region = 32  ;;  %271 = vset.pattern.permute.xlu0 (!%p138_p2), %v280_v1  ;;  %v182_v2 = vld [vmem:[%s326_s2] sm:$0xff] (!%p138_p2) }
   0x7   : > { %177 = vperm.xlu0 (!%p138_p2), %271, %v174_v0  }
   0xb   : > { %185 = vperm.xlu0 (!%p138_p2), %271, %v182_v2  }
   0xd   : > { %s329_s13 = smov (!%p161_p3, %s249_s13), 1 }
   0xe   : > { %s260_s18 = sshll.u32 %s329_s13, 3  ;;  %s261_s22 = sshll.u32 %s329_s13, 4 }
   0xf   : > { %s165_s21 = scalar_lea.vmem %s324_s0, %s260_s18  ;;  %s170_s25 = scalar_lea.vmem %s327_s3, %s261_s22 }
  0x10   : > { %v171_v3 = vld [vmem:[%s165_s21] sm:$0xff] }
  0x11   : > { %v172_v4 = vunpack.c.l.bf16 %v171_v3  ;;  %v173_v5 = vunpack.c.h.bf16 %v171_v3 }
  0x86   : > { %v178_v6 = vpop.permute.xlu0 %177 }
  0x87   : > { %v180_v7 = vmul.f32 %v178_v6, %v172_v4  ;;  %v181_v8 = vmul.f32 %v178_v6, %v173_v5 }
  0x8a   : > { %v186_v9 = vpop.permute.xlu0 %185 }
  0x8b   : > { %v188_v10 = vadd.f32 %v186_v9, %v180_v7  ;;  %v189_v11 = vadd.f32 %v186_v9, %v181_v8 }
  0x8d   : > { %v190_v12 = vmax.f32 %v188_v10, 0.0  ;;  %v191_v13 = vmax.f32 %v189_v11, 0.0 }
  0x8f   : > { %192 = vst [vmem:[%s170_s25] sm:$0xff] %v190_v12  ;;  %193 = vst [vmem:[%s170_s25 + $0x8] sm:$0xff] %v191_v13 }
  0x90 PF: > { %s13_s12 = sadd.s32 1, %s278_s12  }
  0x91   : > { %p10_p4 = scmp.ge.s32.totalorder %s13_s12, 4  }
  0x93   :  { %12 = sbr.rel (!%p10_p4) target bundleno = 1 (0x1), region = 62 }

// kernel: single_conv_pallas.2
= control target key start
LH: loop header
LB: loop body
LE: loop exit
PB: predicated region body
PF: predicated region fallthrough
CT: control target
= control target key end

     0   :  { %s1548_s18 = smov 0   ;;  %s1696_s0 = inlined_call_operand.vmem [shape: bf16[2,4,362], index: 0, kind: input, shape index: {}]   ;;  %s1697_s1 = inlined_call_operand.vmem [shape: bf16[9,8,4], index: 1, kind: input, shape index: {}]   ;;  %s1698_s2 = inlined_call_operand.vmem [shape: f32[8,1], index: 2, kind: input, shape index: {}]   ;;  %s1699_s3 = inlined_call_operand.vmem [shape: f32[1,324], index: 3, kind: input, shape index: {}]   ;;  %s1700_s4 = inlined_call_operand.vmem [shape: bf16[2,8,324], index: 4, kind: output, shape index: {0}]   ;;  %s1701_s5 = inlined_call_operand.vmem [shape: f32[2,8,2], index: 5, kind: output, shape index: {1}]  }
   0x1 LB: > { %s1353_s19 = sadd.s32 4294967295, %s1504_s18   ;;  %p1357_p0 = scmp.ge.s32.totalorder %s1504_s18, 1  ;;  %s1504_s18 = sphi %s1548_s18, %s16_s18  }
   0x2   : > { %p190_p1 = scmp.lt.s32.totalorder %s1504_s18, 3 }
   0x4   : > { %p191_p2 = pnand %p1357_p0, %p190_p1 }
   0x5   : > { %p222_p3 = scmp.lt.s32.totalorder (!%p191_p2), %s1353_s19, 1  ;;  %v246_v0 = vlaneseq (!%p191_p2)  ;;  %v1506_v1 = vmov (!%p191_p2), 1983009808   ;;  %v1507_v3 = vmov (!%p191_p2), 0.0   ;;  %vm1508_vm0 = vmmov (!%p191_p2), 0   ;;  %s1510_s24 = smov (!%p191_p2), 127  }
   0x6   : > { %194 = sbr.rel (%p191_p2) target bundleno = 577 (0x241), region = 36  ;;  %v244_v2 = vunpack.c.l.s4 (!%p191_p2), %v1506_v1  ;;  %1420 = vmatprep.subr.bf16.mxu1 (!%p191_p2), %v1507_v3  ;;  %1422 = vmatprep.mubr.msk.bf16.mxu1 (!%p191_p2), %vm1508_vm0, %v1507_v3  ;;  %v1509_v6 = vmov (!%p191_p2), 0   ;;  %s1511_s25 = smov (!%p191_p2), 126   ;;  %v1204_v13 = vld [vmem:[%s1698_s2] sm:$0xff] (!%p191_p2)  ;;  %vm271_vm1 = vcmask (!%p191_p2), 1041408   ;;  %vm264_vm2 = vcmask (!%p191_p2), 1039360  }
   0x7   : > { %v1559_v4 = vshrl.u32 (!%p191_p2), %v246_v0, 7  ;;  %313 = vmatprep.mubr.bf16.mxu0 (!%p191_p2), %v1509_v6  ;;  %1496 = vset.pattern.permute.xlu0 (!%p191_p2), %v1509_v6  ;;  %s1512_s26 = smov (!%p191_p2), 110   ;;  %s1513_s27 = smov (!%p191_p2), 109   ;;  %v1361_v18 = vld [vmem:[%s1697_s1 + $0x4] sm:$0xf] (!%p191_p2)  ;;  %vm267_vm3 = vcmask (!%p191_p2), 31744  }
   0x8   : > { %v245_v5 = vunpack.c.0.s8 (!%p191_p2), %v244_v2  ;;  %s1514_s28 = smov (!%p191_p2), 108   ;;  %s1515_s29 = smov (!%p191_p2), 92   ;;  %vm463_vm4 = vcmask (!%p191_p2), 1031168   ;;  %v238_v28 = vld [vmem:[%s1697_s1] sm:$0xf] (!%p191_p2)  ;;  %vm570_vm5 = vcmask (!%p191_p2), 900096  }
   0x9   : > { %s1516_s30 = smov (!%p191_p2), 91   ;;  %s1517_s6 = smov (!%p191_p2), 90   ;;  %v1368_v37 = vld [vmem:[%s1697_s1 + $0x8] sm:$0xf] (!%p191_p2)  ;;  %vm677_vm6 = vcmask (!%p191_p2), 891904   ;;  %vm784_vm7 = vcmask (!%p191_p2), 883712  }
   0xa   : > { %v248_v7 = vsub.s32 (!%p191_p2), %v245_v5, %v1559_v4  ;;  %v1372_v46 = vld [vmem:[%s1697_s1 + $0xc] sm:$0xf] (!%p191_p2)  ;;  %v1376_v54 = vld [vmem:[%s1697_s1 + $0x10] sm:$0xf] (!%p191_p2)  ;;  %vm891_vm8 = vcmask (!%p191_p2), 752640   ;;  %vm998_vm9 = vcmask (!%p191_p2), 744448  }
   0xb   : > { %v1380_v62 = vld [vmem:[%s1697_s1 + $0x14] sm:$0xf] (!%p191_p2)  ;;  %vm1105_vm10 = vcmask (!%p191_p2), 736256   ;;  %vm1227_vm11 = vcmask (!%p191_p2), 551936   ;;  %vm1250_vm12 = vcmask (!%p191_p2), 556032   ;;  %vm1263_vm13 = vcmask (!%p191_p2), 7168  }
   0xc   : > { %vm1265_vm14 = vcmask (!%p191_p2), 15360  }
   0xd   : > { %s1703_s19 = smov (!%p222_p3, %s1353_s19), 1 }
   0xe   : > { %s1474_s20 = smul.u32 6, %s1703_s19  ;;  %s1360_s10 = sshll.u32 %s1703_s19, 3 }
   0xf   : > { %s235_s13 = scalar_lea.vmem %s1701_s5, %s1360_s10 }
  0x10   : > { %s226_s23 = scalar_lea.vmem %s1696_s0, %s1474_s20 }
  0x11   : > { %v237_v8 = vld [vmem:[%s226_s23] sm:$0x3f] }
  0x12   : > { %v249_v9 = vrot.slane %v237_v8, %v248_v7  ;;  %v242_v10 = vcombine.high %v237_v8, %v237_v8  ;;  %v1384_v8 = vld [vmem:[%s1697_s1 + $0x18] sm:$0xf] }
  0x14   : > { %258 = vrot.lane.b32.xlu0 %v249_v9, %s1510_s24  ;;  %v256_v11 = vrot.slane %v242_v10, %v248_v7  ;;  %v257_v12 = vcombine.high %v249_v9, %v249_v9  ;;  %v366_v24 = vsel %vm271_vm1, %v249_v9, 0 }
  0x16   : > { %262 = vrot.lane.b32.xlu1 %v256_v11, %s1510_s24  ;;  %v372_v21 = vsel %vm271_vm1, %v256_v11, 0 }
  0x18   : > { %260 = vrot.lane.b32.xlu0 %v257_v12, %s1510_s24 }
  0x1a   : > { %457 = vrot.lane.b32.xlu1 %v249_v9, %s1511_s25 }
  0x1c   : > { %459 = vrot.lane.b32.xlu0 %v257_v12, %s1511_s25 }
  0x1e   : > { %461 = vrot.lane.b32.xlu1 %v256_v11, %s1511_s25 }
  0x20   : > { %564 = vrot.lane.b32.xlu0 %v249_v9, %s1512_s26 }
  0x22   : > { %566 = vrot.lane.b32.xlu1 %v257_v12, %s1512_s26 }
  0x24   : > { %568 = vrot.lane.b32.xlu0 %v256_v11, %s1512_s26 }
  0x26   : > { %671 = vrot.lane.b32.xlu1 %v249_v9, %s1513_s27 }
  0x28   : > { %673 = vrot.lane.b32.xlu0 %v257_v12, %s1513_s27 }
  0x2a   : > { %675 = vrot.lane.b32.xlu1 %v256_v11, %s1513_s27 }
  0x2c   : > { %778 = vrot.lane.b32.xlu0 %v249_v9, %s1514_s28 }
  0x2e   : > { %780 = vrot.lane.b32.xlu1 %v257_v12, %s1514_s28 }
  0x30   : > { %782 = vrot.lane.b32.xlu0 %v256_v11, %s1514_s28 }
  0x32   : > { %885 = vrot.lane.b32.xlu1 %v249_v9, %s1515_s29 }
  0x34   : > { %887 = vrot.lane.b32.xlu0 %v257_v12, %s1515_s29 }
  0x36   : > { %889 = vrot.lane.b32.xlu1 %v256_v11, %s1515_s29 }
  0x38   : > { %992 = vrot.lane.b32.xlu0 %v249_v9, %s1516_s30 }
  0x3a   : > { %994 = vrot.lane.b32.xlu1 %v257_v12, %s1516_s30 }
  0x3c   : > { %996 = vrot.lane.b32.xlu0 %v256_v11, %s1516_s30 }
  0x3e   : > { %1099 = vrot.lane.b32.xlu1 %v249_v9, %s1517_s6 }
  0x40   : > { %1101 = vrot.lane.b32.xlu0 %v257_v12, %s1517_s6 }
  0x42   : > { %1103 = vrot.lane.b32.xlu1 %v256_v11, %s1517_s6  ;;  %s1475_s6 = smul.u32 12, %s1703_s19 }
  0x44   : > { %1207 = vperm.xlu0 %1496, %v1204_v13   ;;  %s231_s9 = scalar_lea.vmem %s1700_s4, %s1475_s6 }
  0x86   : > { %v259_v14 = vpop.permute.xlu0 %258 }
  0x88   : > { %v263_v15 = vpop.permute.xlu1 %262 }
  0x89   : > { %v279_v16 = vsel %vm271_vm1, %v263_v15, 0 }
  0x8a   : > { %v261_v17 = vpop.permute.xlu0 %260  ;;  %1421 = vmatpush3.bf16.msra.mxu1 %v279_v16 }
  0x8b   : > { %v266_v19 = vsel %vm264_vm2, %v261_v17, %v263_v15  ;;  %v265_v20 = vsel %vm264_vm2, %v259_v14, %v261_v17  ;;  %1426 = vmatprep.subr.bf16.mxu1 %v1507_v3  ;;  %v1388_v15 = vld [vmem:[%s1697_s1 + $0x1c] sm:$0xf] }
  0x8c   : > { %1362 = vmatprep.subr.msk.bf16.mxu0 %vm271_vm1, %v266_v19  ;;  %v273_v22 = vsel %vm271_vm1, %v265_v20, 0  ;;  %v458_v23 = vpop.permute.xlu1 %457  ;;  %v1392_v19 = vld [vmem:[%s1697_s1 + $0x20] sm:$0xf] }
  0x8d   : > { %282 = vmatpush1.bf16.msra.mxu0 %v273_v22  ;;  %1423 = vmatmul.mubr.msk.bf16.vlgmr.msra.gmra.mrb[0].mxu1 %vm267_vm3, %v1361_v18 }
  0x8e   : > { %1365 = vmatprep.subr.msk.bf16.mxu0 %vm271_vm1, %v257_v12  ;;  %v460_v25 = vpop.permute.xlu0 %459  ;;  %1427 = vmatpush3.bf16.msra.mxu1 %v372_v21 }
  0x8f   : > { %1428 = vmatprep.mubr.msk.bf16.mxu1 %vm1508_vm0, %v1507_v3  ;;  %1432 = vmatprep.subr.bf16.mxu1 %v1507_v3  ;;  %v464_v30 = vsel %vm463_vm4, %v458_v23, %v460_v25 }
  0x90   : > { %1363 = vmatmul.mubr.msk.bf16.vlgmr.msra.gmra.mrb[0].mxu0 %vm267_vm3, %v1361_v18  ;;  %v462_v26 = vpop.permute.xlu1 %461  ;;  %v470_v33 = vsel %vm271_vm1, %v464_v30, 0 }
  0x91   : > { %375 = vmatpush1.bf16.msra.mxu0 %v366_v24  ;;  %v465_v27 = vsel %vm463_vm4, %v460_v25, %v462_v26  ;;  %406 = vmatprep.mubr.bf16.mxu0 %v1509_v6  ;;  %v476_v31 = vsel %vm271_vm1, %v462_v26, 0 }
  0x92   : > { %1369 = vmatprep.subr.msk.bf16.mxu0 %vm271_vm1, %v465_v27  ;;  %v565_v29 = vpop.permute.xlu0 %564 }
  0x94   : > { %v567_v32 = vpop.permute.xlu1 %566 }
  0x95   : > { %1429 = vmatmul.mubr.msk.bf16.vlgmr.msra.gmra.mrb[4].mxu1 %vm267_vm3, %v238_v28  ;;  %v571_v39 = vsel %vm570_vm5, %v565_v29, %v567_v32 }
  0x96   : > { %1433 = vmatpush3.bf16.msra.mxu1 %v476_v31  ;;  %1434 = vmatprep.mubr.msk.bf16.mxu1 %vm1508_vm0, %v1507_v3  ;;  %v569_v34 = vpop.permute.xlu0 %568  ;;  %v577_v42 = vsel %vm271_vm1, %v571_v39, 0 }
  0x97   : > { %v572_v35 = vsel %vm570_vm5, %v567_v32, %v569_v34  ;;  %1438 = vmatprep.subr.bf16.mxu1 %v1507_v3  ;;  %v583_v40 = vsel %vm271_vm1, %v569_v34, 0 }
  0x98   : > { %1366 = vmatmul.mubr.msk.bf16.vlgmr.msra.gmra.mrb[4].mxu0 %vm267_vm3, %v238_v28  ;;  %v672_v36 = vpop.permute.xlu1 %671 }
  0x99   : > { %479 = vmatpush1.bf16.msra.mxu0 %v470_v33  ;;  %510 = vmatprep.mubr.bf16.mxu0 %v1509_v6 }
  0x9a   : > { %1373 = vmatprep.subr.msk.bf16.mxu0 %vm271_vm1, %v572_v35  ;;  %v674_v38 = vpop.permute.xlu0 %673 }
  0x9b   : > { %v678_v47 = vsel %vm677_vm6, %v672_v36, %v674_v38 }
  0x9c   : > { %v676_v41 = vpop.permute.xlu1 %675  ;;  %v684_v50 = vsel %vm271_vm1, %v678_v47, 0 }
  0x9d   : > { %1435 = vmatmul.mubr.msk.bf16.vlgmr.msra.gmra.mrb[8].mxu1 %vm267_vm3, %v1368_v37  ;;  %v679_v44 = vsel %vm677_vm6, %v674_v38, %v676_v41  ;;  %v690_v48 = vsel %vm271_vm1, %v676_v41, 0 }
  0x9e   : > { %1439 = vmatpush3.bf16.msra.mxu1 %v583_v40  ;;  %1440 = vmatprep.mubr.msk.bf16.mxu1 %vm1508_vm0, %v1507_v3  ;;  %v779_v43 = vpop.permute.xlu0 %778 }
  0x9f   : > { %1444 = vmatprep.subr.bf16.mxu1 %v1507_v3 }
  0xa0   : > { %1370 = vmatmul.mubr.msk.bf16.vlgmr.msra.gmra.mrb[8].mxu0 %vm267_vm3, %v1368_v37  ;;  %v781_v45 = vpop.permute.xlu1 %780 }
  0xa1   : > { %586 = vmatpush1.bf16.msra.mxu0 %v577_v42  ;;  %617 = vmatprep.mubr.bf16.mxu0 %v1509_v6  ;;  %v785_v55 = vsel %vm784_vm7, %v779_v43, %v781_v45 }
  0xa2   : > { %1377 = vmatprep.subr.msk.bf16.mxu0 %vm271_vm1, %v679_v44  ;;  %v783_v49 = vpop.permute.xlu0 %782  ;;  %v791_v58 = vsel %vm271_vm1, %v785_v55, 0 }
  0xa3   : > { %v786_v52 = vsel %vm784_vm7, %v781_v45, %v783_v49  ;;  %v797_v56 = vsel %vm271_vm1, %v783_v49, 0 }
  0xa4   : > { %v886_v51 = vpop.permute.xlu1 %885 }
  0xa5   : > { %1441 = vmatmul.mubr.msk.bf16.vlgmr.msra.gmra.mrb[12].mxu1 %vm267_vm3, %v1372_v46 }
  0xa6   : > { %1445 = vmatpush3.bf16.msra.mxu1 %v690_v48  ;;  %1446 = vmatprep.mubr.msk.bf16.mxu1 %vm1508_vm0, %v1507_v3  ;;  %v888_v53 = vpop.permute.xlu0 %887 }
  0xa7   : > { %1450 = vmatprep.subr.bf16.mxu1 %v1507_v3  ;;  %v892_v63 = vsel %vm891_vm8, %v886_v51, %v888_v53 }
  0xa8   : > { %1374 = vmatmul.mubr.msk.bf16.vlgmr.msra.gmra.mrb[12].mxu0 %vm267_vm3, %v1372_v46  ;;  %v890_v57 = vpop.permute.xlu1 %889  ;;  %v898_v2 = vsel %vm271_vm1, %v892_v63, 0 }
  0xa9   : > { %693 = vmatpush1.bf16.msra.mxu0 %v684_v50  ;;  %724 = vmatprep.mubr.bf16.mxu0 %v1509_v6  ;;  %v893_v60 = vsel %vm891_vm8, %v888_v53, %v890_v57  ;;  %v904_v0 = vsel %vm271_vm1, %v890_v57, 0 }
  0xaa   : > { %1381 = vmatprep.subr.msk.bf16.mxu0 %vm271_vm1, %v786_v52  ;;  %v993_v59 = vpop.permute.xlu0 %992 }
  0xac   : > { %v995_v61 = vpop.permute.xlu1 %994 }
  0xad   : > { %1447 = vmatmul.mubr.msk.bf16.vlgmr.msra.gmra.mrb[16].mxu1 %vm267_vm3, %v1376_v54  ;;  %v999_v9 = vsel %vm998_vm9, %v993_v59, %v995_v61 }
  0xae   : > { %1451 = vmatpush3.bf16.msra.mxu1 %v797_v56  ;;  %1452 = vmatprep.mubr.msk.bf16.mxu1 %vm1508_vm0, %v1507_v3  ;;  %v997_v1 = vpop.permute.xlu0 %996  ;;  %v1005_v13 = vsel %vm271_vm1, %v999_v9, 0 }
  0xaf   : > { %1456 = vmatprep.subr.bf16.mxu1 %v1507_v3  ;;  %v1000_v7 = vsel %vm998_vm9, %v995_v61, %v997_v1  ;;  %v1011_v10 = vsel %vm271_vm1, %v997_v1, 0 }
  0xb0   : > { %1378 = vmatmul.mubr.msk.bf16.vlgmr.msra.gmra.mrb[16].mxu0 %vm267_vm3, %v1376_v54  ;;  %v1100_v5 = vpop.permute.xlu1 %1099 }
  0xb1   : > { %800 = vmatpush1.bf16.msra.mxu0 %v791_v58  ;;  %831 = vmatprep.mubr.bf16.mxu0 %v1509_v6 }
  0xb2   : > { %1385 = vmatprep.subr.msk.bf16.mxu0 %vm271_vm1, %v893_v60  ;;  %v1102_v11 = vpop.permute.xlu0 %1101 }
  0xb3   : > { %v1106_v16 = vsel %vm1105_vm10, %v1100_v5, %v1102_v11 }
  0xb4   : > { %v1104_v12 = vpop.permute.xlu1 %1103  ;;  %v1112_v18 = vsel %vm271_vm1, %v1106_v16, 0 }
  0xb5   : > { %1453 = vmatmul.mubr.msk.bf16.vlgmr.msra.gmra.mrb[20].mxu1 %vm267_vm3, %v1380_v62  ;;  %v1107_v14 = vsel %vm1105_vm10, %v1102_v11, %v1104_v12  ;;  %v1118_v17 = vsel %vm271_vm1, %v1104_v12, 0 }
  0xb6   : > { %1457 = vmatpush3.bf16.msra.mxu1 %v904_v0  ;;  %1458 = vmatprep.mubr.msk.bf16.mxu1 %vm1508_vm0, %v1507_v3 }
  0xb7   : > { %1462 = vmatprep.subr.bf16.mxu1 %v1507_v3 }
  0xb8   : > { %1382 = vmatmul.mubr.msk.bf16.vlgmr.msra.gmra.mrb[20].mxu0 %vm267_vm3, %v1380_v62 }
  0xb9   : > { %907 = vmatpush1.bf16.msra.mxu0 %v898_v2  ;;  %938 = vmatprep.mubr.bf16.mxu0 %v1509_v6 }
  0xba   : > { %1389 = vmatprep.subr.msk.bf16.mxu0 %vm271_vm1, %v1000_v7 }
  0xbd   : > { %1459 = vmatmul.mubr.msk.bf16.vlgmr.msra.gmra.mrb[24].mxu1 %vm267_vm3, %v1384_v8 }
  0xbe   : > { %1463 = vmatpush3.bf16.msra.mxu1 %v1011_v10  ;;  %1464 = vmatprep.mubr.msk.bf16.mxu1 %vm1508_vm0, %v1507_v3 }
  0xbf   : > { %1468 = vmatprep.subr.bf16.mxu1 %v1507_v3 }
  0xc0   : > { %1386 = vmatmul.mubr.msk.bf16.vlgmr.msra.gmra.mrb[24].mxu0 %vm267_vm3, %v1384_v8 }
  0xc1   : > { %1014 = vmatpush1.bf16.msra.mxu0 %v1005_v13  ;;  %1045 = vmatprep.mubr.bf16.mxu0 %v1509_v6 }
  0xc2   : > { %1393 = vmatprep.subr.msk.bf16.mxu0 %vm271_vm1, %v1107_v14 }
  0xc5   : > { %1465 = vmatmul.mubr.msk.bf16.vlgmr.msra.gmra.mrb[28].mxu1 %vm267_vm3, %v1388_v15 }
  0xc6   : > { %1469 = vmatpush3.bf16.msra.mxu1 %v1118_v17  ;;  %1470 = vmatprep.mubr.msk.bf16.mxu1 %vm1508_vm0, %v1507_v3 }
  0xc8   : > { %1390 = vmatmul.mubr.msk.bf16.vlgmr.msra.gmra.mrb[28].mxu0 %vm267_vm3, %v1388_v15 }
  0xc9   : > { %1121 = vmatpush1.bf16.msra.mxu0 %v1112_v18  ;;  %1152 = vmatprep.mubr.bf16.mxu0 %v1509_v6 }
  0xcd   : > { %1471 = vmatmul.mubr.msk.bf16.vlgmr.msra.gmra.mrb[32].mxu1 %vm267_vm3, %v1392_v19 }
  0xd0   : > { %1394 = vmatmul.mubr.msk.bf16.vlgmr.msra.gmra.mrb[32].mxu0 %vm267_vm3, %v1392_v19 }
 0x160   : > { %v356_v20 = vpop.f32.mrb[0].mxu1 }
 0x161   : > { %v1424_v21 = vpop.f32.mrb[1].mxu1 }
 0x162   : > { %v359_v22 = vpop.f32.mrb[2].mxu1 }
 0x163   : > { %v315_v23 = vpop.f32.mrb[0].mxu0  ;;  %v1425_v24 = vpop.f32.mrb[3].mxu1 }
 0x164   : > { %v317_v25 = vpop.f32.mrb[1].mxu0 }
 0x165   : > { %v319_v3 = vpop.f32.mrb[2].mxu0 }
 0x166   : > { %v320_v26 = vpop.f32.mrb[3].mxu0 }
 0x168   : > { %v449_v27 = vpop.f32.mrb[4].mxu1 }
 0x169   : > { %v450_v28 = vadd.f32 %v449_v27, %v356_v20  ;;  %v1430_v29 = vpop.f32.mrb[5].mxu1 }
 0x16a   : > { %v452_v6 = vpop.f32.mrb[6].mxu1 }
 0x16b   : > { %v408_v30 = vpop.f32.mrb[4].mxu0  ;;  %v1431_v31 = vpop.f32.mrb[7].mxu1 }
 0x16c   : > { %v409_v32 = vadd.f32 %v408_v30, %v315_v23  ;;  %v410_v33 = vpop.f32.mrb[5].mxu0 }
 0x16d   : > { %v411_v34 = vadd.f32 %v410_v33, %v317_v25  ;;  %v412_v35 = vpop.f32.mrb[6].mxu0 }
 0x16e   : > { %v413_v36 = vpop.f32.mrb[7].mxu0 }
 0x170   : > { %v553_v37 = vpop.f32.mrb[8].mxu1 }
 0x171   : > { %v561_v38 = vadd.f32 %v553_v37, %v450_v28  ;;  %v1436_v39 = vpop.f32.mrb[9].mxu1 }
 0x172   : > { %v556_v40 = vpop.f32.mrb[10].mxu1 }
 0x173   : > { %v512_v41 = vpop.f32.mrb[8].mxu0  ;;  %v1437_v42 = vpop.f32.mrb[11].mxu1  ;;  %v1241_v40 = vsub.s32 2, %v1559_v4 }
 0x174   : > { %v559_v43 = vadd.f32 %v512_v41, %v409_v32  ;;  %v514_v44 = vpop.f32.mrb[9].mxu0  ;;  %v1229_v41 = vld [vmem:[%s1699_s3] sm:$0x7] }
 0x175   : > { %v560_v45 = vadd.f32 %v514_v44, %v411_v34  ;;  %v516_v46 = vpop.f32.mrb[10].mxu0  ;;  %v1233_v44 = vsub.s32 0, %v1559_v4 }
 0x176   : > { %v517_v47 = vpop.f32.mrb[11].mxu0 }
 0x177   : > { %v1237_v47 = vsub.s32 1, %v1559_v4 }
 0x178   : > { %v660_v48 = vpop.f32.mrb[12].mxu1 }
 0x179   : > { %v668_v49 = vadd.f32 %v660_v48, %v561_v38  ;;  %v1442_v50 = vpop.f32.mrb[13].mxu1 }
 0x17a   : > { %v663_v51 = vpop.f32.mrb[14].mxu1 }
 0x17b   : > { %v619_v52 = vpop.f32.mrb[12].mxu0  ;;  %v1443_v53 = vpop.f32.mrb[15].mxu1 }
 0x17c   : > { %v666_v54 = vadd.f32 %v619_v52, %v559_v43  ;;  %v621_v55 = vpop.f32.mrb[13].mxu0  ;;  %v1208_v43 = vpop.permute.xlu0 %1207 }
 0x17d   : > { %v667_v56 = vadd.f32 %v621_v55, %v560_v45  ;;  %v623_v57 = vpop.f32.mrb[14].mxu0  ;;  %v1234_v55 = vrot.slane %v1229_v41, %v1233_v44 }
 0x17e   : > { %v624_v58 = vpop.f32.mrb[15].mxu0 }
 0x180   : > { %v767_v59 = vpop.f32.mrb[16].mxu1 }
 0x181   : > { %v775_v60 = vadd.f32 %v767_v59, %v668_v49  ;;  %v1448_v61 = vpop.f32.mrb[17].mxu1  ;;  %v1242_v49 = vrot.slane %v1229_v41, %v1241_v40  ;;  %v1238_v59 = vrot.slane %v1229_v41, %v1237_v47 }
 0x182   : > { %v770_v62 = vpop.f32.mrb[18].mxu1 }
 0x183   : > { %v726_v63 = vpop.f32.mrb[16].mxu0  ;;  %v1449_v0 = vpop.f32.mrb[19].mxu1 }
 0x184   : > { %v773_v1 = vadd.f32 %v726_v63, %v666_v54  ;;  %v728_v2 = vpop.f32.mrb[17].mxu0 }
 0x185   : > { %v774_v5 = vadd.f32 %v728_v2, %v667_v56  ;;  %v730_v7 = vpop.f32.mrb[18].mxu0 }
 0x186   : > { %v731_v8 = vpop.f32.mrb[19].mxu0 }
 0x188   : > { %v874_v9 = vpop.f32.mrb[20].mxu1 }
 0x189   : > { %v882_v10 = vadd.f32 %v874_v9, %v775_v60  ;;  %v1454_v11 = vpop.f32.mrb[21].mxu1 }
 0x18a   : > { %v877_v12 = vpop.f32.mrb[22].mxu1 }
 0x18b   : > { %v833_v13 = vpop.f32.mrb[20].mxu0  ;;  %v1455_v14 = vpop.f32.mrb[23].mxu1 }
 0x18c   : > { %v880_v15 = vadd.f32 %v833_v13, %v773_v1  ;;  %v835_v16 = vpop.f32.mrb[21].mxu0 }
 0x18d   : > { %v881_v17 = vadd.f32 %v835_v16, %v774_v5  ;;  %v837_v18 = vpop.f32.mrb[22].mxu0 }
 0x18e   : > { %v838_v19 = vpop.f32.mrb[23].mxu0 }
 0x190   : > { %v981_v20 = vpop.f32.mrb[24].mxu1 }
 0x191   : > { %v989_v21 = vadd.f32 %v981_v20, %v882_v10  ;;  %v1460_v22 = vpop.f32.mrb[25].mxu1 }
 0x192   : > { %v984_v23 = vpop.f32.mrb[26].mxu1 }
 0x193   : > { %v940_v24 = vpop.f32.mrb[24].mxu0  ;;  %v1461_v25 = vpop.f32.mrb[27].mxu1 }
 0x194   : > { %v987_v3 = vadd.f32 %v940_v24, %v880_v15  ;;  %v942_v26 = vpop.f32.mrb[25].mxu0 }
 0x195   : > { %v988_v27 = vadd.f32 %v942_v26, %v881_v17  ;;  %v944_v28 = vpop.f32.mrb[26].mxu0 }
 0x196   : > { %v945_v29 = vpop.f32.mrb[27].mxu0 }
 0x198   : > { %v1088_v6 = vpop.f32.mrb[28].mxu1 }
 0x199   : > { %v1096_v30 = vadd.f32 %v1088_v6, %v989_v21  ;;  %v1466_v31 = vpop.f32.mrb[29].mxu1 }
 0x19a   : > { %v1091_v32 = vpop.f32.mrb[30].mxu1 }
 0x19b   : > { %v1047_v33 = vpop.f32.mrb[28].mxu0  ;;  %v1467_v34 = vpop.f32.mrb[31].mxu1 }
 0x19c   : > { %v1094_v35 = vadd.f32 %v1047_v33, %v987_v3  ;;  %v1049_v36 = vpop.f32.mrb[29].mxu0 }
 0x19d   : > { %v1095_v37 = vadd.f32 %v1049_v36, %v988_v27  ;;  %v1051_v38 = vpop.f32.mrb[30].mxu0 }
 0x19e   : > { %v1052_v39 = vpop.f32.mrb[31].mxu0 }
 0x1a0   : > { %v1195_v42 = vpop.f32.mrb[32].mxu1 }
 0x1a1   : > { %v1203_v45 = vadd.f32 %v1195_v42, %v1096_v30  ;;  %v1472_v46 = vpop.f32.mrb[33].mxu1 }
 0x1a2   : > { %v1198_v48 = vpop.f32.mrb[34].mxu1 }
 0x1a3   : > { %v1212_v50 = vadd.f32 %v1208_v43, %v1203_v45  ;;  %v1154_v51 = vpop.f32.mrb[32].mxu0  ;;  %v1473_v52 = vpop.f32.mrb[35].mxu1 }
 0x1a4   : > { %v1201_v53 = vadd.f32 %v1154_v51, %v1094_v35  ;;  %v1156_v54 = vpop.f32.mrb[33].mxu0 }
 0x1a5   : > { %v1401_v56 = vpack.c.bf16 %v1212_v50, %v1212_v50  ;;  %v1202_v57 = vadd.f32 %v1156_v54, %v1095_v37  ;;  %v1158_v58 = vpop.f32.mrb[34].mxu0  ;;  %v1248_v4 = vmul.f32 %v1242_v49, %v1212_v50 }
 0x1a6   : > { %v1210_v60 = vadd.f32 %v1208_v43, %v1201_v53  ;;  %v1159_v61 = vpop.f32.mrb[35].mxu0 }
 0x1a7   : > { %v1211_v62 = vadd.f32 %v1208_v43, %v1202_v57  ;;  %1228 = vst.msk [vmem:[%s231_s9 + $0x8] sm:$0xf] %vm1227_vm11, %v1401_v56  ;;  %v1257_v5 = vmul.f32 %v1248_v4, %v1212_v50  ;;  %v1251_v9 = vsel %vm1250_vm12, %v1248_v4, 0.0 }
 0x1a8   : > { %v1246_v63 = vmul.f32 %v1234_v55, %v1210_v60 }
 0x1a9   : > { %v1400_v0 = vpack.c.bf16 %v1211_v62, %v1210_v60  ;;  %v1247_v1 = vmul.f32 %v1238_v59, %v1211_v62  ;;  %v1259_v12 = vsel %vm1250_vm12, %v1257_v5, 0.0 }
 0x1aa   : > { %v1255_v2 = vmul.f32 %v1246_v63, %v1210_v60 }
 0x1ab   : > { %1226 = vst [vmem:[%s231_s9] sm:$0xff] %v1400_v0  ;;  %v1249_v7 = vadd.f32 %v1247_v1, %v1246_v63  ;;  %v1256_v8 = vmul.f32 %v1247_v1, %v1211_v62 }
 0x1ad   : > { %v1252_v10 = vadd.f32 %v1251_v9, %v1249_v7  ;;  %v1258_v11 = vadd.f32 %v1256_v8, %v1255_v2 }
 0x1af   : > { %1253 = vadd.xlane.f32.xlu1 %v1252_v10  ;;  %v1260_v13 = vadd.f32 %v1259_v12, %v1258_v11 }
 0x1b1   : > { %1261 = vadd.xlane.f32.xlu0 %v1260_v13 }
 0x23c   : > { %v1254_v14 = vpop.xlane.xlu1 %1253 }
 0x23e   : > { %v1262_v15 = vpop.xlane.xlu0 %1261 }
 0x23f   : > { %v1264_v16 = vsel %vm1263_vm13, %v1254_v14, %v1262_v15 }
 0x240   : > { %1266 = vst.msk [vmem:[%s235_s13] sm:$0xff] %vm1265_vm14, %v1264_v16 }
 0x241 PF: > { %s16_s18 = sadd.s32 1, %s1504_s18  }
 0x242   : > { %p13_p4 = scmp.ge.s32.totalorder %s16_s18, 4  }
 0x244   :  { %15 = sbr.rel (!%p13_p4) target bundleno = 1 (0x1), region = 86 }

</bundles_post_ra>
